<compile_context>
chip_gen: v5e
topology: v5e:2x2
jax: 0.10.0
libtpu: 0.0.40
codegen_flags: <defaults>
</compile_context>

<pallas_src>
import jax
import jax.numpy as jnp
from jax import lax
from jax.experimental import pallas as pl
from jax.experimental.pallas import tpu as pltpu


def _linear_embed_kernel(x_ref, w_ref, b_ref, o_ref):
    # x_ref: (1, C, TILE_T)  -- native (B, C, T) layout; T on the lane axis
    # w_ref: (C, E)          -- PyTorch weight (E, C) transposed once outside
    # b_ref: (1, E)
    # o_ref: (1, TILE_T, E)
    xt = x_ref[0]  # (C, TILE_T)
    # Contract over C (dim 0 of both operands) -> (TILE_T, E); fuses the
    # transpose into the MXU feed instead of a separate HBM pass.
    acc = lax.dot_general(
        xt,
        w_ref[...],
        dimension_numbers=(((0,), (0,)), ((), ())),
        preferred_element_type=jnp.float32,
    )
    o_ref[0] = (acc + b_ref[...]).astype(o_ref.dtype)


def _vmem_budget_and_limit():
    """Generation-aware (working-set budget, scoped-VMEM limit) in bytes."""
    phys = 64 * 1024 * 1024  # conservative fallback: v7x per-TensorCore VMEM
    try:
        info = pltpu.get_tpu_info()
        phys = int(getattr(info, "vmem_capacity_bytes", phys)) or phys
    except Exception:
        pass
    # Cap at 32 MiB working set / 48 MiB scoped limit: raises the old 8 MiB
    # v5e-tuned budget substantially, yet stays safe under v7x's 64 MiB per-TC
    # VMEM even if the query reports per-chip capacity.
    budget = min(phys // 2, 32 * 1024 * 1024)
    limit = min((phys * 3) // 4, 48 * 1024 * 1024)
    return int(budget), int(limit)


def _choose_tile_t(T, C, E, x_bytes, out_bytes, w_bytes, B, budget):
    """Pick a T tile: amortize per-step overhead, respect the VMEM budget."""

    def step_bytes(t):
        # HBM bytes streamed per grid step: x tile read + out tile write.
        return t * (C * x_bytes + E * out_bytes)

    def working_set(t):
        # Double-buffered x/out pipeline blocks + f32 accumulator intermediate
        # + (double-buffered) resident weight & bias buffers.
        return (2 * t * C * x_bytes
                + 2 * t * E * out_bytes
                + t * E * 4
                + 2 * (C * E * w_bytes + E * w_bytes))

    # Target >= ~1.5 MiB of HBM traffic per grid step (~1-2 us at ~1 TB/s) so
    # the ~600-cycle fixed per-step cost is amortized.
    target = 3 * 512 * 1024

    if T <= 128 or (step_bytes(T) <= target and working_set(T) <= budget):
        tile_t = T  # full-T block (block dim == array dim satisfies (8,128))
    else:
        tile_t = 128  # multiples of 128 keep loads/stores lane/sublane aligned
        while (2 * tile_t <= T
               and step_bytes(tile_t) < target
               and working_set(2 * tile_t) <= budget):
            tile_t *= 2

    # v7x megacore load balance: with B == 1, keep >= 2 T tiles so both
    # TensorCores get work.
    if B == 1 and tile_t >= T and T >= 256:
        tile_t = (((T + 1) // 2) + 127) // 128 * 128

    return max(1, min(tile_t, T))


def linear_embedding(x, weight, bias, *, tile_t=None):
    """x: (B, C, T); weight: (E, C); bias: (E,). Returns (B, T, E)."""
    B, C, T = x.shape
    E = weight.shape[0]

    w = weight.T          # (C, E) -- tiny one-time layout glue
    b = bias.reshape(1, E)

    x_bytes = jnp.dtype(x.dtype).itemsize
    out_bytes = x_bytes
    w_bytes = jnp.dtype(w.dtype).itemsize

    budget, vmem_limit = _vmem_budget_and_limit()

    if tile_t is None:
        tile_t = _choose_tile_t(T, C, E, x_bytes, out_bytes, w_bytes, B, budget)
    tile_t = max(1, min(int(tile_t), T))

    # Ragged T handled by Pallas boundary-block masking: no jnp.pad of x and
    # no output slice (each would be a full extra HBM pass).
    grid = (B, pl.cdiv(T, tile_t))

    out = pl.pallas_call(
        _linear_embed_kernel,
        out_shape=jax.ShapeDtypeStruct((B, T, E), x.dtype),
        grid_spec=pltpu.PrefetchScalarGridSpec(
            num_scalar_prefetch=0,
            grid=grid,
            in_specs=[
                # x tile: one batch row, full C, a lane-dense slice of T.
                pl.BlockSpec((1, C, tile_t), lambda bi, ti: (bi, 0, ti)),
                # weight / bias: constant block -> fetched once, VMEM-resident.
                # (For large C*E, add pipeline_mode=pl.Buffered(1) to drop the
                # unused second pipeline buffer.)
                pl.BlockSpec((C, E), lambda bi, ti: (0, 0)),
                pl.BlockSpec((1, E), lambda bi, ti: (0, 0)),
            ],
            out_specs=pl.BlockSpec((1, tile_t, E), lambda bi, ti: (bi, ti, 0)),
        ),
        compiler_params=pltpu.CompilerParams(
            dimension_semantics=("parallel", "parallel"),
            vmem_limit_bytes=vmem_limit,
        ),
    )(x, w, b)
    return out


if __name__ == "__main__":
    # Small shapes consistent with the module: x (B, C, T), Linear(C -> E).
    B, C, T, E = 2, 4, 16, 32

    key = jax.random.PRNGKey(0)
    kx, kw, kb = jax.random.split(key, 3)

    x = jax.random.normal(kx, (B, C, T), dtype=jnp.float32)
    # PyTorch Linear parameter shapes: weight (E, C), bias (E,)
    bound = 1.0 / (C ** 0.5)
    weight = jax.random.uniform(kw, (E, C), minval=-bound, maxval=bound,
                                dtype=jnp.float32)
    bias = jax.random.uniform(kb, (E,), minval=-bound, maxval=bound,
                              dtype=jnp.float32)

    out = jax.block_until_ready(linear_embedding(x, weight, bias))

    # Reference: the PyTorch forward in plain JAX.
    ref = jnp.einsum('bct,ec->bte', x, weight) + bias[None, None, :]
    assert out.shape == (B, T, E)
    assert jnp.allclose(out, ref, atol=1e-5, rtol=1e-5)

    # Second check: ragged T (T not a multiple of tile_t) exercised via the
    # masked boundary block -- no pad/slice HBM passes in the wrapper.
    B2, T2, tile2 = 1, 384, 256
    x2 = jax.random.normal(jax.random.PRNGKey(1), (B2, C, T2), dtype=jnp.float32)
    out2 = jax.block_until_ready(linear_embedding(x2, weight, bias, tile_t=tile2))
    ref2 = jnp.einsum('bct,ec->bte', x2, weight) + bias[None, None, :]
    assert out2.shape == (B2, T2, E)
    assert jnp.allclose(out2, ref2, atol=1e-5, rtol=1e-5)

    print("KERNEL_OK")
</pallas_src>

<mosaic_0001>
module attributes {stable_mosaic.version = 11 : i64} {
  func.func @_linear_embed_kernel(%arg0: i32, %arg1: i32, %arg2: memref<1x4x16xf32, #tpu.memory_space<vmem>>, %arg3: memref<4x32xf32, #tpu.memory_space<vmem>>, %arg4: memref<1x32xf32, #tpu.memory_space<vmem>>, %arg5: memref<1x16x32xf32, #tpu.memory_space<vmem>>) attributes {dimension_semantics = [#tpu.dimension_semantics<parallel>, #tpu.dimension_semantics<parallel>], iteration_bounds = array<i64: 2, 1>, scalar_prefetch = 0 : i64, scratch_operands = 0 : i64, tpu.core_type = #tpu.core_type<tc>, window_params = [{transform_indices = @transform_0, window_bounds = array<i64: 1, 4, 16>}, {pipeline_mode = #tpu.pipeline_mode<synchronous>, transform_indices = @transform_1, window_bounds = array<i64: 4, 32>}, {pipeline_mode = #tpu.pipeline_mode<synchronous>, transform_indices = @transform_2, window_bounds = array<i64: 1, 32>}, {transform_indices = @transform_3, window_bounds = array<i64: 1, 16, 32>}]} {
    %c0 = arith.constant 0 : index
    %c0_0 = arith.constant 0 : index
    %c0_1 = arith.constant 0 : index
    %0 = vector.load %arg2[%c0, %c0_0, %c0_1] : memref<1x4x16xf32, #tpu.memory_space<vmem>>, vector<1x4x16xf32>
    %1 = vector.shape_cast %0 : vector<1x4x16xf32> to vector<4x16xf32>
    %c0_2 = arith.constant 0 : index
    %c0_3 = arith.constant 0 : index
    %2 = vector.load %arg3[%c0_2, %c0_3] : memref<4x32xf32, #tpu.memory_space<vmem>>, vector<4x32xf32>
    %cst = arith.constant dense<0.000000e+00> : vector<16x32xf32>
    %3 = tpu.matmul %1, %2, %cst {dimension_numbers = #tpu.dot_dimension_numbers<[0], [0], [1], [1], [0, 1, 1, 1], [], []>} : vector<4x16xf32>, vector<4x32xf32>, vector<16x32xf32> -> vector<16x32xf32>
    %c0_4 = arith.constant 0 : index
    %c0_5 = arith.constant 0 : index
    %4 = vector.load %arg4[%c0_4, %c0_5] : memref<1x32xf32, #tpu.memory_space<vmem>>, vector<1x32xf32>
    %5 = vector.broadcast %4 : vector<1x32xf32> to vector<16x32xf32>
    %6 = arith.addf %3, %5 : vector<16x32xf32>
    %c0_6 = arith.constant 0 : index
    %c0_7 = arith.constant 0 : index
    %c0_8 = arith.constant 0 : index
    %7 = vector.load %arg5[%c0_6, %c0_7, %c0_8] : memref<1x16x32xf32, #tpu.memory_space<vmem>>, vector<1x16x32xf32>
    %8 = vector.shape_cast %7 : vector<1x16x32xf32> to vector<16x32xf32>
    %9 = vector.shape_cast %6 : vector<16x32xf32> to vector<1x16x32xf32>
    tpu.vector_store %arg5[%c0_6, %c0_7, %c0_8], %9 {strides = array<i32>} : memref<1x16x32xf32, #tpu.memory_space<vmem>>, vector<1x16x32xf32>,
    return
  }
  func.func @transform_0(%arg0: i32, %arg1: i32) -> (i32, i32, i32) {
    %c0_i32 = arith.constant 0 : i32
    %c0_i32_0 = arith.constant 0 : i32
    return %arg0, %c0_i32, %arg1 : i32, i32, i32
  }
  func.func @transform_1(%arg0: i32, %arg1: i32) -> (i32, i32) {
    %c0_i32 = arith.constant 0 : i32
    %c0_i32_0 = arith.constant 0 : i32
    %c0_i32_1 = arith.constant 0 : i32
    return %c0_i32, %c0_i32_0 : i32, i32
  }
  func.func @transform_2(%arg0: i32, %arg1: i32) -> (i32, i32) {
    %c0_i32 = arith.constant 0 : i32
    %c0_i32_0 = arith.constant 0 : i32
    %c0_i32_1 = arith.constant 0 : i32
    return %c0_i32, %c0_i32_0 : i32, i32
  }
  func.func @transform_3(%arg0: i32, %arg1: i32) -> (i32, i32, i32) {
    %c0_i32 = arith.constant 0 : i32
    %c0_i32_0 = arith.constant 0 : i32
    return %arg0, %arg1, %c0_i32 : i32, i32, i32
  }
}

</mosaic_0001>

<bundles_post_ra>
// kernel: tpu_custom_call.1
= control target key start
LH: loop header
LB: loop body
LE: loop exit
PB: predicated region body
PF: predicated region fallthrough
CT: control target
= control target key end

     0   :  { %8 = vsyncpa [#allocation3], 0  ;;  %s831_s0 = inlined_call_operand.hbm [shape: f32[2,4,16], index: 0, kind: input, shape index: {}]   ;;  %s832_s1 = inlined_call_operand.hbm [shape: f32[4,32], index: 1, kind: input, shape index: {}]   ;;  %s833_s2 = inlined_call_operand.vmem [shape: f32[1,32], index: 2, kind: input, shape index: {}]   ;;  %s834_s3 = inlined_call_operand.hbm [shape: f32[2,16,32], index: 3, kind: output, shape index: {}]  }
   0x1   :  { %10 = vsyncpa [#allocation3 + $0x1], 0 }
   0x2   :  { %11 = vsyncpa [#allocation6], 0 }
   0x3   :  { %12 = vsyncpa [#allocation4], 0 }
   0x4   :  { %14 = vsyncpa [#allocation4 + $0x1], 0  ;;  %s678_s12 = smov 0   ;;  %s680_s13 = smov 0  }
   0x5   :  { %s682_s14 = smov 0   ;;  %s684_s15 = smov 0  }
   0x6   :  { %s686_s16 = smov 0   ;;  %s688_s17 = smov 0  }
   0x7 LB: > { %s409_s18 = sadd.s32 4294967295, %s653_s17   ;;  %s410_s19 = sadd.s32 4294967294, %s653_s17   ;;  %s653_s17 = sphi %s688_s17, %s20_s17   ;;  %s649_s16 = sphi %s686_s16, %s846_s16   ;;  %s645_s15 = sphi %s684_s15, %s845_s15   ;;  %s641_s14 = sphi %s682_s14, %s844_s14   ;;  %s637_s13 = sphi %s680_s13, %s843_s13   ;;  %s633_s12 = sphi %s678_s12, %s842_s12  }
   0x8   : > { %p54_p0 = scmp.ne.s32.totalorder %s637_s13, %s633_s12  ;;  %p712_p1 = scmp.eq.s32.totalorder %s409_s18, 0 }
   0x9   : > { %p716_p2 = scmp.eq.s32.totalorder %s409_s18, 1  ;;  %p128_p3 = scmp.eq.s32.totalorder %s410_s19, 1 }
   0xa   : > { %p722_p4 = por %p712_p1, %p54_p0  ;;  %p411_p5 = scmp.ge.s32.totalorder %s653_s17, 1 }
   0xb   : > { %p727_p6 = por %p128_p3, %p54_p0  ;;  %p135_p7 = scmp.lt.s32.totalorder %s653_s17, 3 }
   0xc   : > { %s147_s26 = sshll.u32 %s832_s1, 4  ;;  %p413_p9 = scmp.ge.s32.totalorder %s653_s17, 2  ;;  %s148_s26 = int_to_ptr.hbm [resolvable:$true] %s147_s26 }
   0xd   : > { %p735_p8 = pnand %p411_p5, %p135_p7  ;;  %s655_s28 = smov [#allocation5]  }
   0xe   : > { %s149_s29 = sshll.u32 %s655_s28, 4  ;;  %s32_s30 = sadd.s32 1, %s649_s16  ;;  %s150_s29 = int_to_ptr.vmem [resolvable:$true] %s149_s29 }
   0xf   : > { %p438_p10 = pneg %p735_p8  ;;  %p34_p12 = scmp.ge.s32.totalorder %s32_s30, 2 }
  0x10   : > { %s41_s4 = sadd.s32 1, %s641_s14  ;;  %p48_p13 = scmp.ne.s32.totalorder %s641_s14, %s637_s13 }
  0x11   : > { %p439_p11 = pnand %p438_p10, %p712_p1  ;;  %p49_p0 = scmp.eq.s32.totalorder %s653_s17, 0 }
  0x12   : > { %s848_s30 = smov (%p34_p12, %s32_s30), 0  ;;  %p757_p5 = por %p716_p2, %p48_p13 }
  0x13   : > { %441 = dma.hbm_to_vmem [thread:$0]  (!%p439_p11), %s148_s26, 64, %s150_s29, [#allocation6]  }
  0x14   : > { %p751_p3 = por %p49_p0, %p48_p13  ;;  %s36_s7 = ssub.s32 %s649_s16, %s848_s30 }
  0x15   : > { %p451_p7 = scmp.lt.s32.totalorder %s653_s17, 2  ;;  %p39_p10 = scmp.eq.s32.totalorder %s36_s7, 0 }
  0x16   : > { %s163_s8 = sand.u32 1, %s641_s14   ;;  %s415_s11 = sshll.u32 %s649_s16, 2 }
  0x17   : > { %s414_s9 = sshll.u32 %s163_s8, 2  ;;  %s172_s24 = scalar_lea.hbm %s831_s0, %s415_s11 }
  0x18   : > { %s766_s10 = scalar_select %p39_p10, %s641_s14, %s41_s4  }
  0x19   : > { %s167_s25 = scalar_lea.vmem [#allocation2], %s414_s9  ;;  %s174_s21 = sshll.u32 %s172_s24, 4  ;;  %s175_s21 = int_to_ptr.hbm [resolvable:$true] %s174_s21 }
  0x1a   : > { %s176_s26 = sshll.u32 %s167_s25, 4  ;;  %p443_p2 = pnand %p451_p7, %p751_p3  ;;  %s177_s26 = int_to_ptr.vmem [resolvable:$true] %s176_s26 }
  0x1b   : > { %s164_s28 = scalar_lea.sflag [#allocation3], %s163_s8  ;;  %185 = sbr.rel (%p735_p8) target bundleno = 341 (0x155), region = 32 }
  0x1c   : > { %445 = dma.hbm_to_vmem [thread:$0]  (!%p443_p2), %s175_s21, 64, %s177_s26, %s164_s28  }
  0x1d   : > { %s777_s29 = sand.u32 (!%p735_p8), 1, %s637_s13  }
  0x1e   : > { %s417_s4 = sshll.u32 (!%p735_p8), %s777_s29, 2  ;;  %s188_s7 = scalar_lea.sflag (!%p735_p8), [#allocation3], %s777_s29 }
  0x1f   : > { %s191_s9 = scalar_lea.vmem (!%p735_p8), [#allocation2], %s417_s4 }
  0x20   : > { %620 = dma.done.wait (%p722_p4), %s188_s7, 64  }
  0x21   : > { %622 = vsyncadd (%p722_p4), %s188_s7, 4294967232 }
  0x22   : > { %624 = dma.done.wait (%p712_p1), [#allocation6], 64  }
  0x23   : > { %626 = vsyncadd (%p712_p1), [#allocation6], 4294967232  ;;  %vm266_vm0 = vcmask 1043456   ;;  %v221_v0 = vld [vmem:[%s191_s9] sm:$0xf]  ;;  %vm259_vm1 = vcmask 31744  }
  0x24   : > { %v222_v1 = vld [vmem:[#allocation5] sm:$0xf]  ;;  %227 = vxpose.xlu0.b32.start.end [1/1] (short) (narrow) %v221_v0, 16  ;;  %s419_s22 = sshll.u32 %s777_s29, 4  ;;  %v506_v4 = vld [vmem:[%s833_s2] ss:$0 sm:$0xff] }
  0x25   : > { %420 = vmatpush.msk.msra.mxu0 %vm266_vm0, %v222_v1  ;;  %429 = vmatpush.msk.msra.mxu1 %vm266_vm0, %v222_v1  ;;  %s428_s20 = sshll.u32 %s645_s15, 4  ;;  %vm293_vm2 = vcmask 261120   ;;  %s219_s19 = scalar_lea.vmem [#allocation7], %s419_s22 }
  0x26   : > { %s310_s18 = scalar_lea.hbm %s834_s3, %s428_s20  ;;  %s311_s24 = sshll.u32 %s219_s19, 4  ;;  %s312_s24 = int_to_ptr.vmem [resolvable:$true] %s311_s24 }
  0x27   : > { %s313_s25 = sshll.u32 %s310_s18, 4  ;;  %s297_s26 = scalar_lea.sflag [#allocation4], %s777_s29  ;;  %s314_s25 = int_to_ptr.hbm [resolvable:$true] %s313_s25 }
  0x28   : > { %s581_s21 = sshra.s32 %s314_s25, 4  ;;  %s587_s7 = scalar_lea.hbm %s834_s3, 32  ;;  %s582_s21 = int_to_ptr.hbm [resolvable:$true] %s581_s21 }
  0x29   : > { %s583_s15 = scalar_lea.hbm %s582_s21, 16  ;;  %p588_p11 = scmp.lt.s32.totalorder %s582_s21, %s834_s3 }
  0x2a   : > { %p584_p1 = scmp.ne.s32.totalorder %s582_s21, %s583_s15  ;;  %p589_p12 = scmp.lt.s32.totalorder %s587_s7, %s583_s15 }
  0x2c   : > { %p585_p4 = pnand %p584_p1, %p757_p5  ;;  %p590_p13 = por %p589_p12, %p588_p11 }
  0x2e   : > { %p586_p8 = pneg %p585_p4 }
  0x30   : > { %p591_p0 = pnand %p590_p13, %p586_p8 }
  0xc8   : > { %v243_v2 = vpop.trf.xlu0 }
  0xc9   : > { %421 = vmatmul.msk.f32.vlgmr.msra.gmra.mxu0 %vm259_vm1, %v243_v2 }
  0xd0   : > { %v244_v3 = vpop.trf.xlu0 }
  0xd1   : > { %422 = vmatmul.msk.f32.vlgmr.msra.gmra.mxu1 %vm259_vm1, %v244_v3 }
 0x146   : > { %v287_v5 = vpop.f32.mrf.mxu0 }
 0x147   : > { %v288_v6 = vadd.f32 %v506_v4, %v287_v5 }
 0x149   : > { %294 = vst.msk [vmem:[%s219_s19] sm:$0xff] %vm293_vm2, %v288_v6 }
 0x14e   : > { %v290_v7 = vpop.f32.mrf.mxu1 }
 0x14f   : > { %v291_v8 = vadd.f32 %v506_v4, %v290_v7 }
 0x151   : > { %295 = vst.msk [vmem:[%s219_s19 + $0x8] sm:$0xff] %vm293_vm2, %v291_v8 }
 0x152   : > { %594 = shalt.err (!%p591_p0)
}
 0x153   : > { %s656_s29 = smov 128   ;;  %s657_s27 = smov 8  }
 0x154   : > { %436 = dma.vmem_to_hbm [thread:$0]  (%p757_p5), %s312_s24, 256, %s314_s25, %s297_s26, %s656_s29, %s656_s29, %s657_s27  }
 0x155 PF: > { %s328_s5 = sand.u32 1, %s633_s12   ;;  %p447_p3 = pnand %p413_p9, %p727_p6 }
 0x156   : > { %s329_s20 = scalar_lea.sflag [#allocation4], %s328_s5 }
 0x157   : > { %p448_p7 = pneg %p447_p3 }
 0x159   : > { %628 = dma.done.wait (%p448_p7), %s329_s20, 256  }
 0x15a   : > { %630 = vsyncadd (%p448_p7), %s329_s20, 4294967040  ;;  %s20_s17 = sadd.s32 1, %s653_s17   ;;  %s842_s12 = smov %s637_s13 }
 0x15b   : > { %p17_p10 = scmp.ge.s32.totalorder %s20_s17, 4   ;;  %s843_s13 = smov %s641_s14 }
 0x15c   : > { %s844_s14 = smov %s766_s10  ;;  %s845_s15 = smov %s649_s16 }
 0x15d   : > { %s846_s16 = smov %s848_s30  ;;  %19 = sbr.rel (!%p17_p10) target bundleno = 7 (0x7), region = 81 }
 0x162   :  { %335 = vsyncpa [#allocation3], 1 }
 0x163   :  { %337 = vsyncpa [#allocation3 + $0x1], 1 }
 0x164   :  { %338 = vsyncpa [#allocation6], 1 }
 0x165   :  { %339 = vsyncpa [#allocation4], 1 }
 0x166   :  { %341 = vsyncpa [#allocation4 + $0x1], 1 }

</bundles_post_ra>
